<compile_context>
chip_gen: v7x
topology: tpu7x:2x2x1
jax: 0.10.0
libtpu: 0.0.40
codegen_flags: <defaults>
</compile_context>

<pallas_src>
import functools

import jax
import jax.numpy as jnp
from jax import lax
from jax.experimental import pallas as pl
from jax.experimental.pallas import tpu as pltpu

_LANE = 128
_SUBLANE = 8
_TB_MAX = 2048


def _round_up(x: int, m: int) -> int:
    return ((x + m - 1) // m) * m


def _qnetwork_kernel(x_ref, w1_ref, b1_ref, w2_ref, b2_ref, w3t_ref, b3_ref,
                     o_ref, *, negative_activation: bool):
    # state tile: (TB, num_inputs) f32 -> bf16 (cast inside kernel, VPU work)
    x = x_ref[...].astype(jnp.bfloat16)

    # linear1 + ReLU  (bf16 MXU, f32 accumulate / elementwise)
    h = jnp.dot(x, w1_ref[...], preferred_element_type=jnp.float32) + b1_ref[...]
    h = jnp.maximum(h, 0.0)

    # linear2 + ReLU
    h = jnp.dot(h.astype(jnp.bfloat16), w2_ref[...],
                preferred_element_type=jnp.float32) + b2_ref[...]
    h = jnp.maximum(h, 0.0)

    # linear3, computed transposed: q^T = w3 @ h^T  ->  (A8, TB), batch on lanes
    q_t = lax.dot_general(
        w3t_ref[...], h.astype(jnp.bfloat16),
        dimension_numbers=(((1,), (1,)), ((), ())),
        preferred_element_type=jnp.float32,
    ) + b3_ref[...]

    if negative_activation:
        # -softplus(q), numerically stable: softplus(q) = max(q,0) + log1p(exp(-|q|))
        q_t = -(jnp.maximum(q_t, 0.0) + jnp.log1p(jnp.exp(-jnp.abs(q_t))))

    o_ref[...] = q_t.astype(o_ref.dtype)


def _choose_batch_tile(batch: int) -> int:
    """Small batches: one tile rounded to 16 rows (bf16 sublane packing).
    Large batches: tiles up to 2048 rows, but always >= 2 grid steps so the
    'parallel' batch axis can be sharded across v7x's two TensorCores."""
    b = _round_up(batch, 16)
    if b <= 512:
        return b
    half = _round_up(pl.cdiv(b, 2), _LANE)
    return min(_TB_MAX, half)


def qnetwork_forward(state, params, num_actions: int, negative_activation: bool):
    """QNetwork forward pass as a single batch-tiled Pallas kernel call.

    `state` is (batch, num_inputs) float32 (fed unpadded in the feature dim);
    `params` come from `init_qnetwork_params`.
    Returns (batch, num_actions) float32.
    """
    w1, b1, w2, b2, w3t, b3 = params
    batch, num_inputs = state.shape
    h_p = w1.shape[1]
    a8 = w3t.shape[0]

    tb = _choose_batch_tile(batch)
    grid_n = pl.cdiv(batch, tb)
    batch_p = grid_n * tb

    x = state
    if batch_p != batch:
        # Row padding only (tiny); the feature dim is never padded.
        x = jnp.pad(state, ((0, batch_p - batch), (0, 0)))

    kernel = functools.partial(_qnetwork_kernel,
                               negative_activation=negative_activation)

    flops = 2 * batch_p * (num_inputs * h_p + h_p * h_p + h_p * a8)
    transcendentals = 2 * batch_p * a8 if negative_activation else 0
    bytes_accessed = (batch_p * num_inputs * 4            # f32 state in
                      + a8 * batch_p * 4                   # f32 q^T out
                      + (w1.size + w2.size + w3t.size) * 2  # bf16 weights
                      + (b1.size + b2.size + b3.size) * 4)  # f32 biases

    out_t = pl.pallas_call(
        kernel,
        out_shape=jax.ShapeDtypeStruct((a8, batch_p), jnp.float32),
        grid=(grid_n,),
        in_specs=[
            pl.BlockSpec((tb, num_inputs), lambda i: (i, 0)),  # state: batch-tiled, unpadded features
            pl.BlockSpec((num_inputs, h_p), lambda i: (0, 0)),  # w1: VMEM-resident
            pl.BlockSpec((1, h_p), lambda i: (0, 0)),           # b1
            pl.BlockSpec((h_p, h_p), lambda i: (0, 0)),         # w2
            pl.BlockSpec((1, h_p), lambda i: (0, 0)),           # b2
            pl.BlockSpec((a8, h_p), lambda i: (0, 0)),          # w3 (PyTorch layout, padded)
            pl.BlockSpec((a8, 1), lambda i: (0, 0)),            # b3 (column vector)
        ],
        out_specs=pl.BlockSpec((a8, tb), lambda i: (0, i)),     # q^T: lane-dense over batch
        compiler_params=pltpu.CompilerParams(
            dimension_semantics=("parallel",)),
        cost_estimate=pl.CostEstimate(flops=flops,
                                      transcendentals=transcendentals,
                                      bytes_accessed=bytes_accessed),
    )(x, w1, b1, w2, b2, w3t, b3)

    # Drop padded action rows / batch columns and restore (batch, num_actions).
    return out_t[:num_actions, :batch].T


def init_qnetwork_params(key, num_inputs, num_actions, hidden_dim):
    """Xavier-uniform weights, zero biases (mirrors weights_init_).

    w1: (num_inputs, h_p) bf16          -- real K, hidden padded to 128 lanes
    w2: (h_p, h_p) bf16
    w3: (round_up(num_actions, 8), h_p) bf16  -- PyTorch layout (out, in), padded
    b1/b2: (1, h_p) f32;  b3: (round_up(num_actions, 8), 1) f32
    """
    def xavier_uniform(k, fan_in, fan_out):
        limit = jnp.sqrt(6.0 / (fan_in + fan_out))
        return jax.random.uniform(k, (fan_in, fan_out), jnp.float32, -limit, limit)

    def pad2(a, rows, cols):
        out = jnp.zeros((rows, cols), a.dtype)
        return out.at[:a.shape[0], :a.shape[1]].set(a)

    h_p = _round_up(hidden_dim, _LANE)
    a8 = _round_up(num_actions, _SUBLANE)

    k1, k2, k3 = jax.random.split(key, 3)
    w1 = pad2(xavier_uniform(k1, num_inputs, hidden_dim),
              num_inputs, h_p).astype(jnp.bfloat16)
    w2 = pad2(xavier_uniform(k2, hidden_dim, hidden_dim),
              h_p, h_p).astype(jnp.bfloat16)
    # store linear3 in PyTorch (out_features, in_features) layout for the transposed head
    w3t = pad2(xavier_uniform(k3, hidden_dim, num_actions).T,
               a8, h_p).astype(jnp.bfloat16)
    b1 = jnp.zeros((1, h_p), jnp.float32)
    b2 = jnp.zeros((1, h_p), jnp.float32)
    b3 = jnp.zeros((a8, 1), jnp.float32)
    return (w1, b1, w2, b2, w3t, b3)


def qnetwork_reference(state, params, num_actions: int, negative_activation: bool):
    """Plain-JAX reference using the same padded bf16 params / f32 accumulation."""
    w1, b1, w2, b2, w3t, b3 = params
    x = state.astype(jnp.bfloat16)
    h = jax.nn.relu(jnp.dot(x, w1, preferred_element_type=jnp.float32) + b1)
    h = jax.nn.relu(jnp.dot(h.astype(jnp.bfloat16), w2,
                            preferred_element_type=jnp.float32) + b2)
    q = jnp.dot(h.astype(jnp.bfloat16), w3t.T,
                preferred_element_type=jnp.float32) + b3.T
    if negative_activation:
        q = -jax.nn.softplus(q)
    return q[:, :num_actions]


if __name__ == "__main__":
    key = jax.random.PRNGKey(0)
    k_params, k_state, k_b1, k_b2, k_b3, k_big = jax.random.split(key, 6)

    num_inputs = 16
    hidden_dim = 32
    num_actions = 4

    params = init_qnetwork_params(k_params, num_inputs, num_actions, hidden_dim)

    # Give the biases small non-zero values (within the real region only) so the
    # bias-add path is actually exercised.
    w1, b1, w2, b2, w3t, b3 = params
    b1 = b1.at[0, :hidden_dim].set(
        jax.random.uniform(k_b1, (hidden_dim,), jnp.float32, -0.1, 0.1))
    b2 = b2.at[0, :hidden_dim].set(
        jax.random.uniform(k_b2, (hidden_dim,), jnp.float32, -0.1, 0.1))
    b3 = b3.at[:num_actions, 0].set(
        jax.random.uniform(k_b3, (num_actions,), jnp.float32, -0.1, 0.1))
    params = (w1, b1, w2, b2, w3t, b3)

    ok = True

    # Small batch (single 16-row tile, exercises row padding 8 -> 16).
    state_small = jax.random.normal(k_state, (8, num_inputs), jnp.float32)
    # Larger batch (exercises the batch-tiled grid path, TB=512, grid=(2,)).
    state_big = jax.random.normal(k_big, (1024, num_inputs), jnp.float32)

    for state in (state_small, state_big):
        for negative_activation in (False, True):
            out = qnetwork_forward(state, params, num_actions, negative_activation)
            out = jax.block_until_ready(out)
            ref = qnetwork_reference(state, params, num_actions, negative_activation)
            if not jnp.allclose(out, ref, atol=2e-3, rtol=2e-3):
                ok = False

    if ok:
        print("KERNEL_OK")
</pallas_src>

<mosaic_0001>
module attributes {stable_mosaic.version = 11 : i64} {
  func.func @_qnetwork_kernel(%arg0: i32, %arg1: memref<16x16xf32, #tpu.memory_space<vmem>>, %arg2: memref<16x128xbf16, #tpu.memory_space<vmem>>, %arg3: memref<1x128xf32, #tpu.memory_space<vmem>>, %arg4: memref<128x128xbf16, #tpu.memory_space<vmem>>, %arg5: memref<1x128xf32, #tpu.memory_space<vmem>>, %arg6: memref<8x128xbf16, #tpu.memory_space<vmem>>, %arg7: memref<8x1xf32, #tpu.memory_space<vmem>>, %arg8: memref<8x16xf32, #tpu.memory_space<vmem>>) attributes {dimension_semantics = [#tpu.dimension_semantics<parallel>], iteration_bounds = array<i64: 1>, scalar_prefetch = 0 : i64, scratch_operands = 0 : i64, tpu.core_type = #tpu.core_type<tc>, window_params = [{transform_indices = @transform_0, window_bounds = array<i64: 16, 16>}, {pipeline_mode = #tpu.pipeline_mode<synchronous>, transform_indices = @transform_1, window_bounds = array<i64: 16, 128>}, {pipeline_mode = #tpu.pipeline_mode<synchronous>, transform_indices = @transform_2, window_bounds = array<i64: 1, 128>}, {pipeline_mode = #tpu.pipeline_mode<synchronous>, transform_indices = @transform_3, window_bounds = array<i64: 128, 128>}, {pipeline_mode = #tpu.pipeline_mode<synchronous>, transform_indices = @transform_4, window_bounds = array<i64: 1, 128>}, {pipeline_mode = #tpu.pipeline_mode<synchronous>, transform_indices = @transform_5, window_bounds = array<i64: 8, 128>}, {pipeline_mode = #tpu.pipeline_mode<synchronous>, transform_indices = @transform_6, window_bounds = array<i64: 8, 1>}, {transform_indices = @transform_7, window_bounds = array<i64: 8, 16>}]} {
    %c0 = arith.constant 0 : index
    %c0_0 = arith.constant 0 : index
    %0 = vector.load %arg1[%c0, %c0_0] : memref<16x16xf32, #tpu.memory_space<vmem>>, vector<16x16xf32>
    %1 = arith.truncf %0 : vector<16x16xf32> to vector<16x16xbf16>
    %c0_1 = arith.constant 0 : index
    %c0_2 = arith.constant 0 : index
    %2 = vector.load %arg2[%c0_1, %c0_2] : memref<16x128xbf16, #tpu.memory_space<vmem>>, vector<16x128xbf16>
    %cst = arith.constant dense<0.000000e+00> : vector<16x128xf32>
    %3 = tpu.matmul %1, %2, %cst {dimension_numbers = #tpu.dot_dimension_numbers<[1], [0], [0], [1], [0, 0, 1, 1], [], []>} : vector<16x16xbf16>, vector<16x128xbf16>, vector<16x128xf32> -> vector<16x128xf32>
    %c0_3 = arith.constant 0 : index
    %c0_4 = arith.constant 0 : index
    %4 = vector.load %arg3[%c0_3, %c0_4] : memref<1x128xf32, #tpu.memory_space<vmem>>, vector<1x128xf32>
    %5 = vector.broadcast %4 : vector<1x128xf32> to vector<16x128xf32>
    %6 = arith.addf %3, %5 : vector<16x128xf32>
    %cst_5 = arith.constant 0.000000e+00 : f32
    %7 = vector.broadcast %cst_5 : f32 to vector<16x128xf32>
    %8 = arith.maximumf %6, %7 : vector<16x128xf32>
    %9 = arith.truncf %8 : vector<16x128xf32> to vector<16x128xbf16>
    %c0_6 = arith.constant 0 : index
    %c0_7 = arith.constant 0 : index
    %10 = vector.load %arg4[%c0_6, %c0_7] : memref<128x128xbf16, #tpu.memory_space<vmem>>, vector<128x128xbf16>
    %cst_8 = arith.constant dense<0.000000e+00> : vector<16x128xf32>
    %11 = tpu.matmul %9, %10, %cst_8 {dimension_numbers = #tpu.dot_dimension_numbers<[1], [0], [0], [1], [0, 0, 1, 1], [], []>} : vector<16x128xbf16>, vector<128x128xbf16>, vector<16x128xf32> -> vector<16x128xf32>
    %c0_9 = arith.constant 0 : index
    %c0_10 = arith.constant 0 : index
    %12 = vector.load %arg5[%c0_9, %c0_10] : memref<1x128xf32, #tpu.memory_space<vmem>>, vector<1x128xf32>
    %13 = vector.broadcast %12 : vector<1x128xf32> to vector<16x128xf32>
    %14 = arith.addf %11, %13 : vector<16x128xf32>
    %cst_11 = arith.constant 0.000000e+00 : f32
    %15 = vector.broadcast %cst_11 : f32 to vector<16x128xf32>
    %16 = arith.maximumf %14, %15 : vector<16x128xf32>
    %c0_12 = arith.constant 0 : index
    %c0_13 = arith.constant 0 : index
    %17 = vector.load %arg6[%c0_12, %c0_13] : memref<8x128xbf16, #tpu.memory_space<vmem>>, vector<8x128xbf16>
    %18 = arith.truncf %16 : vector<16x128xf32> to vector<16x128xbf16>
    %cst_14 = arith.constant dense<0.000000e+00> : vector<8x16xf32>
    %19 = tpu.matmul %17, %18, %cst_14 {dimension_numbers = #tpu.dot_dimension_numbers<[1], [1], [0], [0], [0, 0, 1, 0], [], []>} : vector<8x128xbf16>, vector<16x128xbf16>, vector<8x16xf32> -> vector<8x16xf32>
    %c0_15 = arith.constant 0 : index
    %c0_16 = arith.constant 0 : index
    %20 = vector.load %arg7[%c0_15, %c0_16] : memref<8x1xf32, #tpu.memory_space<vmem>>, vector<8x1xf32>
    %21 = vector.broadcast %20 : vector<8x1xf32> to vector<8x16xf32>
    %22 = arith.addf %19, %21 : vector<8x16xf32>
    %c0_17 = arith.constant 0 : index
    %c0_18 = arith.constant 0 : index
    %23 = vector.load %arg8[%c0_17, %c0_18] : memref<8x16xf32, #tpu.memory_space<vmem>>, vector<8x16xf32>
    tpu.vector_store %arg8[%c0_17, %c0_18], %22 {strides = array<i32>} : memref<8x16xf32, #tpu.memory_space<vmem>>, vector<8x16xf32>,
    return
  }
  func.func @transform_0(%arg0: i32) -> (i32, i32) {
    %c0_i32 = arith.constant 0 : i32
    %c0_i32_0 = arith.constant 0 : i32
    return %arg0, %c0_i32 : i32, i32
  }
  func.func @transform_1(%arg0: i32) -> (i32, i32) {
    %c0_i32 = arith.constant 0 : i32
    %c0_i32_0 = arith.constant 0 : i32
    %c0_i32_1 = arith.constant 0 : i32
    return %c0_i32, %c0_i32_0 : i32, i32
  }
  func.func @transform_2(%arg0: i32) -> (i32, i32) {
    %c0_i32 = arith.constant 0 : i32
    %c0_i32_0 = arith.constant 0 : i32
    %c0_i32_1 = arith.constant 0 : i32
    return %c0_i32, %c0_i32_0 : i32, i32
  }
  func.func @transform_3(%arg0: i32) -> (i32, i32) {
    %c0_i32 = arith.constant 0 : i32
    %c0_i32_0 = arith.constant 0 : i32
    %c0_i32_1 = arith.constant 0 : i32
    return %c0_i32, %c0_i32_0 : i32, i32
  }
  func.func @transform_4(%arg0: i32) -> (i32, i32) {
    %c0_i32 = arith.constant 0 : i32
    %c0_i32_0 = arith.constant 0 : i32
    %c0_i32_1 = arith.constant 0 : i32
    return %c0_i32, %c0_i32_0 : i32, i32
  }
  func.func @transform_5(%arg0: i32) -> (i32, i32) {
    %c0_i32 = arith.constant 0 : i32
    %c0_i32_0 = arith.constant 0 : i32
    %c0_i32_1 = arith.constant 0 : i32
    return %c0_i32, %c0_i32_0 : i32, i32
  }
  func.func @transform_6(%arg0: i32) -> (i32, i32) {
    %c0_i32 = arith.constant 0 : i32
    %c0_i32_0 = arith.constant 0 : i32
    %c0_i32_1 = arith.constant 0 : i32
    return %c0_i32, %c0_i32_0 : i32, i32
  }
  func.func @transform_7(%arg0: i32) -> (i32, i32) {
    %c0_i32 = arith.constant 0 : i32
    %c0_i32_0 = arith.constant 0 : i32
    return %c0_i32, %arg0 : i32, i32
  }
}

</mosaic_0001>

<bundles_post_ra>
// kernel: tpu_custom_call.1
= control target key start
LH: loop header
LB: loop body
LE: loop exit
PB: predicated region body
PF: predicated region fallthrough
CT: control target
= control target key end

     0   :  { %12 = vsyncpa [#allocation3], 0  ;;  %s556_s0 = inlined_call_operand.hbm [shape: f32[16,16], index: 0, kind: input, shape index: {}]   ;;  %s557_s1 = inlined_call_operand.vmem [shape: bf16[16,128], index: 1, kind: input, shape index: {}]   ;;  %s558_s2 = inlined_call_operand.vmem [shape: f32[1,128], index: 2, kind: input, shape index: {}]   ;;  %s559_s3 = inlined_call_operand.hbm [shape: bf16[128,128], index: 3, kind: input, shape index: {}]   ;;  %s560_s4 = inlined_call_operand.vmem [shape: f32[1,128], index: 4, kind: input, shape index: {}]   ;;  %s561_s5 = inlined_call_operand.vmem [shape: bf16[8,128], index: 5, kind: input, shape index: {}]   ;;  %s562_s6 = inlined_call_operand.vmem [shape: f32[8,1], index: 6, kind: input, shape index: {}]   ;;  %s563_s7 = inlined_call_operand.hbm [shape: f32[8,16], index: 7, kind: output, shape index: {}]  }
   0x1   :  { %13 = vsyncpa [#allocation6], 0 }
   0x2   :  { %14 = vsyncpa [#allocation4], 0  ;;  %s450_s24 = smov [#allocation2]   ;;  %s378_s28 = scalar_lea.hbm %s556_s0, 256 }
   0x3   :  { %s20_s25 = sshll.u32 %s450_s24, 4  ;;  %p379_p0 = scmp.ne.s32.totalorder %s556_s0, %s378_s28  ;;  %s21_s25 = int_to_ptr.vmem [resolvable:$true] %s20_s25 }
   0x4   :  { %p382_p1 = scmp.lt.u32.totalorder %s378_s28, %s556_s0 }
   0x6   :  { %p384_p2 = pnand %p382_p1, %p379_p0 }
   0x8   :  { %387 = shalt.err (!%p384_p2)
}
   0x9   :  { %s388_s10 = scalar_lea.vmem %s21_s25, 256  ;;  %p393_p4 = scmp.lt.s32.totalorder %s21_s25, %s21_s25 }
   0xa   :  { %p389_p3 = scmp.ne.s32.totalorder %s21_s25, %s388_s10  ;;  %p394_p5 = scmp.lt.s32.totalorder %s388_s10, %s388_s10 }
   0xc   :  { %p395_p6 = por %p394_p5, %p393_p4 }
   0xe   :  { %p396_p7 = pnand %p395_p6, %p389_p3 }
  0x10   :  { %399 = shalt.err (!%p396_p7)
}
  0x11   :  { %s451_s11 = smov 128   ;;  %s452_s12 = smov 8  }
  0x12   :  { %26 = dma.hbm_to_vmem [thread:$0]  %s556_s0, 256, %s21_s25, [#allocation3], %s451_s11, %s451_s11, %s452_s12  }
  0x13   :  { %s453_s15 = smov [#allocation5]   ;;  %s400_s19 = scalar_lea.hbm %s559_s3, 1024 }
  0x14   :  { %s36_s16 = sshll.u32 %s453_s15, 4  ;;  %p401_p8 = scmp.ne.s32.totalorder %s559_s3, %s400_s19  ;;  %s37_s16 = int_to_ptr.vmem [resolvable:$true] %s36_s16 }
  0x15   :  { %p404_p9 = scmp.lt.u32.totalorder %s400_s19, %s559_s3 }
  0x17   :  { %p406_p10 = pnand %p404_p9, %p401_p8 }
  0x19   :  { %409 = shalt.err (!%p406_p10)
}
  0x1a   :  { %s410_s24 = scalar_lea.vmem %s37_s16, 1024  ;;  %p415_p12 = scmp.lt.s32.totalorder %s37_s16, %s37_s16 }
  0x1b   :  { %p411_p11 = scmp.ne.s32.totalorder %s37_s16, %s410_s24  ;;  %p416_p13 = scmp.lt.s32.totalorder %s410_s24, %s410_s24 }
  0x1d   :  { %p417_p0 = por %p416_p13, %p415_p12 }
  0x1f   :  { %p418_p1 = pnand %p417_p0, %p411_p11 }
  0x21   :  { %421 = shalt.err (!%p418_p1)
}
  0x22   :  { %s454_s0 = smov 64   ;;  %s455_s25 = smov 4  }
  0x23   :  { %42 = dma.hbm_to_vmem [thread:$0]  %s559_s3, 1024, %s37_s16, [#allocation6], %s454_s0, %s454_s0, %s455_s25  }
  0x24   :  { %444 = dma.done.wait [#allocation3], 256  }
  0x25   :  { %445 = vsyncadd [#allocation3], 4294967040 }
  0x26   :  { %446 = dma.done.wait [#allocation6], 1024  }
  0x27   :  { %447 = vsyncadd [#allocation6], 4294966272  ;;  %v456_v0 = vmov 0.0   ;;  %vm457_vm0 = vmmov 0   ;;  %v369_v1 = vld [vmem:[%s557_s1] sm:$0xff]   ;;  %v57_v3 = vld [vmem:[#allocation2 + $0x8] sm:$0xff] }
  0x28   :  { %326 = vmatprep.subr.bf16.mxu0 %v456_v0  ;;  %328 = vmatprep.mubr.msk.bf16.mxu0 %vm457_vm0, %v456_v0  ;;  %v56_v2 = vld [vmem:[#allocation2] sm:$0xff]  ;;  %vm74_vm1 = vcmask 130048   ;;  %v370_v5 = vld [vmem:[#allocation5] sm:$0xff]   ;;  %v371_v6 = vld [vmem:[#allocation5 + $0x8] sm:$0xff]   ;;  %v458_v24 = vmov 0  }
  0x29   :  { %332 = vmatprep.subr.bf16.mxu1 %v456_v0  ;;  %348 = vmatprep.mubr.msk.bf16.mxu1 %vm457_vm0, %v456_v0  ;;  %v58_v4 = vpack.c.bf16 %v57_v3, %v56_v2  ;;  %v372_v7 = vld [vmem:[#allocation5 + $0x10] sm:$0xff]   ;;  %v373_v8 = vld [vmem:[#allocation5 + $0x18] sm:$0xff]   ;;  %v374_v9 = vld [vmem:[#allocation5 + $0x20] sm:$0xff]  }
  0x2a   :  { %327 = vmatpush3.bf16.msra.mxu0 %v369_v1  ;;  %333 = vmatpush3.bf16.msra.mxu1 %v370_v5  ;;  %v375_v10 = vld [vmem:[#allocation5 + $0x28] sm:$0xff]   ;;  %v376_v11 = vld [vmem:[#allocation5 + $0x30] sm:$0xff]   ;;  %v377_v12 = vld [vmem:[#allocation5 + $0x38] sm:$0xff]  }
  0x2b   :  { %352 = vmatprep.subr.bf16.mxu0 %v456_v0  ;;  %334 = vmatprep.subr.bf16.mxu1 %v456_v0  ;;  %v301_v13 = vld [vmem:[%s558_s2] ss:$0 sm:$0xff] }
  0x2c   :  { %v238_v23 = vld [vmem:[%s562_s6] sm:$0xff]  ;;  %368 = vset.pattern.permute.xlu0 %v458_v24  ;;  %s459_s6 = smov [#allocation7]  }
  0x2d   :  { %329 = vmatmul.mubr.msk.bf16.vlgmr.msra.gmra.mrb[0].mxu0 %vm74_vm1, %v58_v4  ;;  %241 = vperm.xlu0 %368, %v238_v23   ;;  %v304_v25 = vld [vmem:[%s560_s4] ss:$0 sm:$0xff]  ;;  %s291_s12 = sshll.u32 %s459_s6, 4  ;;  %s292_s12 = int_to_ptr.vmem [resolvable:$true] %s291_s12 }
  0x2e   :  { %354 = vmatprep.mubr.msk.bf16.mxu0 %vm457_vm0, %v456_v0  ;;  %335 = vmatpush3.bf16.msra.mxu1 %v371_v6  ;;  %v236_v35 = vld [vmem:[%s561_s5] sm:$0xf]  ;;  %s422_s4 = scalar_lea.vmem %s292_s12, 128  ;;  %p427_p3 = scmp.lt.s32.totalorder %s292_s12, %s292_s12 }
  0x2f   :  { %336 = vmatprep.subr.bf16.mxu1 %v456_v0  ;;  %p423_p2 = scmp.ne.s32.totalorder %s292_s12, %s422_s4  ;;  %p428_p4 = scmp.lt.s32.totalorder %s422_s4, %s422_s4 }
  0x31   :  { %p429_p5 = por %p428_p4, %p427_p3 }
  0x32   :  { %337 = vmatpush3.bf16.msra.mxu1 %v372_v7 }
  0x33   :  { %338 = vmatprep.subr.bf16.mxu1 %v456_v0  ;;  %p430_p6 = pnand %p429_p5, %p423_p2 }
  0x36   :  { %339 = vmatpush3.bf16.msra.mxu1 %v373_v8 }
  0x37   :  { %340 = vmatprep.subr.bf16.mxu1 %v456_v0 }
  0x3a   :  { %341 = vmatpush3.bf16.msra.mxu1 %v374_v9 }
  0x3b   :  { %342 = vmatprep.subr.bf16.mxu1 %v456_v0 }
  0x3e   :  { %343 = vmatpush3.bf16.msra.mxu1 %v375_v10 }
  0x3f   :  { %344 = vmatprep.subr.bf16.mxu1 %v456_v0 }
  0x42   :  { %345 = vmatpush3.bf16.msra.mxu1 %v376_v11 }
  0x43   :  { %346 = vmatprep.subr.bf16.mxu1 %v456_v0 }
  0x46   :  { %347 = vmatpush3.bf16.msra.mxu1 %v377_v12 }
  0xac   :  { %v242_v36 = vpop.permute.xlu0 %241 }
 0x100   :  { %v112_v14 = vpop.f32.mrb[0].mxu0 }
 0x101   :  { %v113_v15 = vadd.f32 %v301_v13, %v112_v14  ;;  %v330_v16 = vpop.f32.mrb[1].mxu0 }
 0x102   :  { %v115_v17 = vpop.f32.mrb[2].mxu0 }
 0x103   :  { %v116_v18 = vadd.f32 %v301_v13, %v115_v17  ;;  %v331_v19 = vpop.f32.mrb[3].mxu0  ;;  %v119_v20 = vmax.f32 %v113_v15, 0.0 }
 0x105   :  { %v120_v21 = vmax.f32 %v116_v18, 0.0 }
 0x107   :  { %v121_v22 = vpack.c.bf16 %v120_v21, %v119_v20 }
 0x109   :  { %349 = vmatmul.mubr.bf16.vlgmr.msra.gmra.mrb[0].mxu1 %v121_v22 }
 0x1dc   :  { %v227_v26 = vpop.f32.mrb[0].mxu1 }
 0x1dd   :  { %v228_v27 = vadd.f32 %v304_v25, %v227_v26  ;;  %v350_v28 = vpop.f32.mrb[1].mxu1 }
 0x1de   :  { %v230_v29 = vpop.f32.mrb[2].mxu1 }
 0x1df   :  { %v231_v30 = vadd.f32 %v304_v25, %v230_v29  ;;  %v351_v31 = vpop.f32.mrb[3].mxu1  ;;  %v234_v32 = vmax.f32 %v228_v27, 0.0 }
 0x1e1   :  { %v235_v33 = vmax.f32 %v231_v30, 0.0 }
 0x1e3   :  { %v237_v34 = vpack.c.bf16 %v235_v33, %v234_v32 }
 0x1e5   :  { %353 = vmatpush3.bf16.xpose.msra.mxu0 %v237_v34 }
 0x1ec   :  { %355 = vmatmul.mubr.bf16.vlgmr.msra.gmra.mrb[4].mxu0 %v236_v35 }
 0x2bf   :  { %v278_v37 = vpop.f32.mrb[4].mxu0 }
 0x2c0   :  { %v279_v38 = vadd.f32 %v278_v37, %v242_v36  ;;  %v356_v39 = vpop.f32.mrb[5].mxu0 }
 0x2c1   :  { %v281_v40 = vpop.f32.mrb[6].mxu0 }
 0x2c2   :  { %284 = vst.msk [vmem:[#allocation7] sm:$0xff] %vm74_vm1, %v279_v38  ;;  %v357_v41 = vpop.f32.mrb[7].mxu0 }
 0x2c3   :  { %433 = shalt.err (!%p430_p6)
}
 0x2c4   :  { %s434_s14 = scalar_lea.hbm %s563_s7, 128 }
 0x2c5   :  { %p435_p7 = scmp.ne.s32.totalorder %s563_s7, %s434_s14  ;;  %p438_p8 = scmp.lt.u32.totalorder %s434_s14, %s563_s7 }
 0x2c7   :  { %p440_p9 = pnand %p438_p8, %p435_p7 }
 0x2c9   :  { %443 = shalt.err (!%p440_p9)
}
 0x2ca   :  { %294 = dma.vmem_to_hbm [thread:$0]  %s292_s12, 128, %s563_s7, [#allocation4]  }
 0x2cb   :  { %448 = dma.done.wait [#allocation4], 128  }
 0x2cc   :  { %449 = vsyncadd [#allocation4], 4294967168 }
 0x2cd   :  { %298 = vsyncpa [#allocation3], 1 }
 0x2ce   :  { %299 = vsyncpa [#allocation6], 1 }
 0x2cf   :  { %300 = vsyncpa [#allocation4], 1 }

</bundles_post_ra>
